<compile_context>
chip_gen: v6e
topology: v6e:2x2x1
jax: 0.10.0
libtpu: 0.0.40
codegen_flags: <defaults>
</compile_context>

<pallas_src>
import jax
import jax.numpy as jnp
from jax.experimental import pallas as pl
from jax.experimental.pallas import tpu as pltpu

_LANES = 128


def sum_kernel(x_ref, y_ref, o_ref):
    # Cast in-kernel: VALU slack is free in a DMA-bound kernel, and it lets
    # mixed-dtype inputs stream from HBM at their native (narrower) width.
    o_ref[...] = x_ref[...].astype(o_ref.dtype) + y_ref[...].astype(o_ref.dtype)


def _chip_kind():
    try:
        return jax.devices()[0].device_kind.lower()
    except Exception:
        return ""


def _per_buffer_bytes():
    kind = _chip_kind()
    # v5e scoped-VMEM default is 16 MiB -> 3 streams x 2 bufs x 2 MiB = 12 MiB.
    if "v5e" in kind or "v5 lite" in kind or "v5lite" in kind:
        return 2 << 20
    # v6e/v7x scoped defaults are 32 MiB -> 4 MiB/buffer = 24 MiB live.
    return 4 << 20


def _row_dim_semantics():
    kind = _chip_kind()
    if "v7" in kind:
        # Only CORE_PARALLEL actually shards a grid axis across v7x's two TCs.
        return (getattr(pltpu, "CORE_PARALLEL", "parallel"),)
    return ("parallel",)


def pallas_sum(x, y, *, max_width=512):
    """Elementwise x + y (DARTS `Sum`) via a lane-dense tiled Pallas kernel."""
    assert x.shape == y.shape, "Sum requires matching shapes"
    out_dtype = jnp.result_type(x.dtype, y.dtype)
    orig_shape = x.shape
    n = x.size

    if n == 0:
        return jnp.zeros(orig_shape, out_dtype)

    itemsizes = (jnp.dtype(x.dtype).itemsize,
                 jnp.dtype(y.dtype).itemsize,
                 jnp.dtype(out_dtype).itemsize)
    bytes_per_elem = sum(itemsizes)

    # ---------------- small-input fast path ----------------
    # Whole array in one VMEM block (block_shape == full dims), grid=(1,):
    # no pad, no reshape slab, no output slice.
    if n * max(itemsizes) <= (1 << 20):
        xs, ys = x, y
        if x.ndim < 2:  # give Mosaic a 2-D view (free reshape)
            xs, ys = x.reshape(1, n), y.reshape(1, n)
        nd = xs.ndim
        blk = xs.shape
        spec = pl.BlockSpec(blk, lambda i: (0,) * nd)
        out = pl.pallas_call(
            sum_kernel,
            out_shape=jax.ShapeDtypeStruct(blk, out_dtype),
            grid_spec=pltpu.PrefetchScalarGridSpec(
                num_scalar_prefetch=0,
                grid=(1,),
                in_specs=[spec, spec],
                out_specs=pl.BlockSpec(blk, lambda i: (0,) * nd),
            ),
            compiler_params=pltpu.CompilerParams(
                dimension_semantics=("arbitrary",)),
            cost_estimate=pl.CostEstimate(
                flops=n, transcendentals=0, bytes_accessed=n * bytes_per_elem),
        )(xs, ys)
        return out.reshape(orig_shape)

    # ---------------- large-input streaming path ----------------
    # Pick the widest lane-dense width (multiple of 128) that divides n so the
    # slab reshape is a free bitcast and no padding / output slice is needed.
    width = 0
    for cand in (max_width, 256, _LANES):
        if n % cand == 0:
            width = cand
            break
    padded = width == 0
    if padded:
        # Rare fallback: n is not a multiple of 128. Pad the flat stream by
        # < width elements to keep lane-dense, unmasked vld/vst tiles.
        width = max_width

    rows = pl.cdiv(n, width)

    # dtype-aware sublane rounding keeps packed vregs full for narrow dtypes.
    min_item = min(itemsizes)
    sublane_mult = 8 * max(1, 4 // max(1, min_item))

    # Size the row tile in BYTES so each stream's block hits the per-chip
    # per-buffer budget (Pallas double-buffers each stream automatically).
    per_buf = _per_buffer_bytes()
    tm = (per_buf // (width * max(itemsizes))) // sublane_mult * sublane_mult
    tm = max(sublane_mult, tm)
    tm = min(tm, sublane_mult * pl.cdiv(rows, sublane_mult))

    xf = x.reshape(-1)
    yf = y.reshape(-1)
    if padded:
        total = rows * width
        xf = jnp.pad(xf, (0, total - n))
        yf = jnp.pad(yf, (0, total - n))
    x2 = xf.reshape(rows, width)
    y2 = yf.reshape(rows, width)

    grid = (pl.cdiv(rows, tm),)  # partial last row-block is masked by Pallas

    out = pl.pallas_call(
        sum_kernel,
        out_shape=jax.ShapeDtypeStruct((rows, width), out_dtype),
        grid_spec=pltpu.PrefetchScalarGridSpec(
            num_scalar_prefetch=0,
            grid=grid,
            in_specs=[
                pl.BlockSpec((tm, width), lambda i: (i, 0)),
                pl.BlockSpec((tm, width), lambda i: (i, 0)),
            ],
            out_specs=pl.BlockSpec((tm, width), lambda i: (i, 0)),
        ),
        compiler_params=pltpu.CompilerParams(
            dimension_semantics=_row_dim_semantics()),
        cost_estimate=pl.CostEstimate(
            flops=rows * width,
            transcendentals=0,
            bytes_accessed=rows * width * bytes_per_elem),
    )(x2, y2)

    if padded:
        return out.reshape(-1)[:n].reshape(orig_shape)
    return out.reshape(orig_shape)


if __name__ == "__main__":
    key = jax.random.PRNGKey(0)
    k1, k2, k3, k4, k5, k6 = jax.random.split(key, 6)

    # Primary demo at the small DARTS-like shape (batch=2, seq=8, hidden=32).
    B, T, D = 2, 8, 32
    x = jax.random.normal(k1, (B, T, D), dtype=jnp.float32)
    y = jax.random.normal(k2, (B, T, D), dtype=jnp.float32)
    out = jax.block_until_ready(pallas_sum(x, y))
    ref = x + y
    assert out.shape == ref.shape and out.dtype == ref.dtype
    assert jnp.allclose(out, ref, atol=0.0, rtol=0.0)

    # Streaming (lane-dense, no-pad) path: size % 512 == 0.
    xl = jax.random.normal(k3, (512, 1024), dtype=jnp.float32)
    yl = jax.random.normal(k4, (512, 1024), dtype=jnp.float32)
    outl = jax.block_until_ready(pallas_sum(xl, yl))
    assert jnp.allclose(outl, xl + yl, atol=0.0, rtol=0.0)

    # Rare padded fallback path: size not a multiple of 128.
    xp = jax.random.normal(k5, (1031, 517), dtype=jnp.float32)
    yp = jax.random.normal(k6, (1031, 517), dtype=jnp.float32)
    outp = jax.block_until_ready(pallas_sum(xp, yp))
    assert jnp.allclose(outp, xp + yp, atol=0.0, rtol=0.0)

    print("KERNEL_OK")
</pallas_src>

<mosaic_0001>
module attributes {stable_mosaic.version = 11 : i64} {
  func.func @sum_kernel(%arg0: i32, %arg1: memref<2x8x32xf32, #tpu.memory_space<vmem>>, %arg2: memref<2x8x32xf32, #tpu.memory_space<vmem>>, %arg3: memref<2x8x32xf32, #tpu.memory_space<vmem>>) attributes {dimension_semantics = [#tpu.dimension_semantics<arbitrary>], iteration_bounds = array<i64: 1>, scalar_prefetch = 0 : i64, scratch_operands = 0 : i64, tpu.core_type = #tpu.core_type<tc>, window_params = [{pipeline_mode = #tpu.pipeline_mode<synchronous>, transform_indices = @transform_0, window_bounds = array<i64: 2, 8, 32>}, {pipeline_mode = #tpu.pipeline_mode<synchronous>, transform_indices = @transform_1, window_bounds = array<i64: 2, 8, 32>}, {pipeline_mode = #tpu.pipeline_mode<synchronous>, transform_indices = @transform_2, window_bounds = array<i64: 2, 8, 32>}]} {
    %c0 = arith.constant 0 : index
    %c0_0 = arith.constant 0 : index
    %c0_1 = arith.constant 0 : index
    %0 = vector.load %arg1[%c0, %c0_0, %c0_1] : memref<2x8x32xf32, #tpu.memory_space<vmem>>, vector<2x8x32xf32>
    %c0_2 = arith.constant 0 : index
    %c0_3 = arith.constant 0 : index
    %c0_4 = arith.constant 0 : index
    %1 = vector.load %arg2[%c0_2, %c0_3, %c0_4] : memref<2x8x32xf32, #tpu.memory_space<vmem>>, vector<2x8x32xf32>
    %2 = arith.addf %0, %1 : vector<2x8x32xf32>
    %c0_5 = arith.constant 0 : index
    %c0_6 = arith.constant 0 : index
    %c0_7 = arith.constant 0 : index
    %3 = vector.load %arg3[%c0_5, %c0_6, %c0_7] : memref<2x8x32xf32, #tpu.memory_space<vmem>>, vector<2x8x32xf32>
    tpu.vector_store %arg3[%c0_5, %c0_6, %c0_7], %2 {strides = array<i32>} : memref<2x8x32xf32, #tpu.memory_space<vmem>>, vector<2x8x32xf32>,
    return
  }
  func.func @transform_0(%arg0: i32) -> (i32, i32, i32) {
    %c0_i32 = arith.constant 0 : i32
    %c0_i32_0 = arith.constant 0 : i32
    %c0_i32_1 = arith.constant 0 : i32
    %c0_i32_2 = arith.constant 0 : i32
    return %c0_i32, %c0_i32_0, %c0_i32_1 : i32, i32, i32
  }
  func.func @transform_1(%arg0: i32) -> (i32, i32, i32) {
    %c0_i32 = arith.constant 0 : i32
    %c0_i32_0 = arith.constant 0 : i32
    %c0_i32_1 = arith.constant 0 : i32
    %c0_i32_2 = arith.constant 0 : i32
    return %c0_i32, %c0_i32_0, %c0_i32_1 : i32, i32, i32
  }
  func.func @transform_2(%arg0: i32) -> (i32, i32, i32) {
    %c0_i32 = arith.constant 0 : i32
    %c0_i32_0 = arith.constant 0 : i32
    %c0_i32_1 = arith.constant 0 : i32
    %c0_i32_2 = arith.constant 0 : i32
    return %c0_i32, %c0_i32_0, %c0_i32_1 : i32, i32, i32
  }
}

</mosaic_0001>

<bundles_post_ra>
// kernel: tpu_custom_call.1
= control target key start
LH: loop header
LB: loop body
LE: loop exit
PB: predicated region body
PF: predicated region fallthrough
CT: control target
= control target key end

     0   :  { %7 = vsyncpa [#allocation3], 0  ;;  %s176_s0 = inlined_call_operand.hbm [shape: f32[2,8,32], index: 0, kind: input, shape index: {}]   ;;  %s177_s1 = inlined_call_operand.hbm [shape: f32[2,8,32], index: 1, kind: input, shape index: {}]   ;;  %s178_s2 = inlined_call_operand.hbm [shape: f32[2,8,32], index: 2, kind: output, shape index: {}]  }
   0x1   :  { %8 = vsyncpa [#allocation6], 0 }
   0x2   :  { %9 = vsyncpa [#allocation4], 0  ;;  %s138_s9 = smov [#allocation2]  }
   0x3   :  { %s15_s10 = sshll.u32 %s138_s9, 4  ;;  %s16_s10 = int_to_ptr.vmem [resolvable:$true] %s15_s10 }
   0x4   :  { %s80_s11 = scalar_lea.vmem %s16_s10, 256  ;;  %p85_p1 = scmp.lt.s32.totalorder %s16_s10, %s16_s10 }
   0x5   :  { %p81_p0 = scmp.ne.s32.totalorder %s16_s10, %s80_s11  ;;  %p86_p2 = scmp.lt.s32.totalorder %s80_s11, %s80_s11 }
   0x7   :  { %p87_p3 = por %p86_p2, %p85_p1 }
   0x9   :  { %p88_p4 = pnand %p87_p3, %p81_p0 }
   0xb   :  { %91 = shalt.err (!%p88_p4)
}
   0xc   :  { %s139_s12 = smov 128   ;;  %s140_s13 = smov 8  }
   0xd   :  { %21 = dma.hbm_to_vmem [thread:$0]  %s176_s0, 256, %s16_s10, [#allocation3], %s139_s12, %s139_s12, %s140_s13  }
   0xe   :  { %s141_s16 = smov [#allocation5]  }
   0xf   :  { %s27_s17 = sshll.u32 %s141_s16, 4  ;;  %s28_s17 = int_to_ptr.vmem [resolvable:$true] %s27_s17 }
  0x10   :  { %s100_s18 = scalar_lea.vmem %s28_s17, 256  ;;  %p105_p6 = scmp.lt.s32.totalorder %s28_s17, %s28_s17 }
  0x11   :  { %p101_p5 = scmp.ne.s32.totalorder %s28_s17, %s100_s18  ;;  %p106_p7 = scmp.lt.s32.totalorder %s100_s18, %s100_s18 }
  0x13   :  { %p107_p8 = por %p106_p7, %p105_p6 }
  0x15   :  { %p108_p9 = pnand %p107_p8, %p101_p5 }
  0x17   :  { %111 = shalt.err (!%p108_p9)
}
  0x18   :  { %33 = dma.hbm_to_vmem [thread:$0]  %s177_s1, 256, %s28_s17, [#allocation6], %s139_s12, %s139_s12, %s140_s13  }
  0x19   :  { %132 = dma.done.wait [#allocation3], 256  }
  0x1a   :  { %133 = vsyncadd [#allocation3], 4294967040 }
  0x1b   :  { %134 = dma.done.wait [#allocation6], 256  }
  0x1c   :  { %135 = vsyncadd [#allocation6], 4294967040  ;;  %s142_s0 = smov [#allocation7]   ;;  %v40_v0 = vld [vmem:[#allocation2] sm:$0xff]  ;;  %v42_v1 = vld [vmem:[#allocation5] sm:$0xff]  ;;  %vm46_vm0 = vcmask 261120  }
  0x1d   :  { %s54_s21 = sshll.u32 %s142_s0, 4  ;;  %v41_v2 = vld [vmem:[#allocation2 + $0x8] sm:$0xff]  ;;  %v44_v3 = vadd.f32 %v42_v1, %v40_v0  ;;  %v43_v4 = vld [vmem:[#allocation5 + $0x8] sm:$0xff]  ;;  %s55_s21 = int_to_ptr.vmem [resolvable:$true] %s54_s21 }
  0x1e   :  { %v45_v5 = vadd.f32 %v43_v4, %v41_v2  ;;  %s112_s22 = scalar_lea.vmem %s55_s21, 256  ;;  %p117_p11 = scmp.lt.s32.totalorder %s55_s21, %s55_s21 }
  0x1f   :  { %47 = vst.msk [vmem:[#allocation7] sm:$0xff] %vm46_vm0, %v44_v3  ;;  %p113_p10 = scmp.ne.s32.totalorder %s55_s21, %s112_s22  ;;  %p118_p12 = scmp.lt.s32.totalorder %s112_s22, %s112_s22 }
  0x20   :  { %48 = vst.msk [vmem:[#allocation7 + $0x8] sm:$0xff] %vm46_vm0, %v45_v5 }
  0x21   :  { %p119_p13 = por %p118_p12, %p117_p11 }
  0x23   :  { %p120_p0 = pnand %p119_p13, %p113_p10 }
  0x25   :  { %123 = shalt.err (!%p120_p0)
}
  0x26   :  { %60 = dma.vmem_to_hbm [thread:$0]  %s55_s21, 256, %s178_s2, [#allocation4], %s139_s12, %s139_s12, %s140_s13  }
  0x27   :  { %136 = dma.done.wait [#allocation4], 256  }
  0x28   :  { %137 = vsyncadd [#allocation4], 4294967040 }
  0x29   :  { %64 = vsyncpa [#allocation3], 1 }
  0x2a   :  { %65 = vsyncpa [#allocation6], 1 }
  0x2b   :  { %66 = vsyncpa [#allocation4], 1 }

</bundles_post_ra>
